<compile_context>
chip_gen: v6e
topology: v6e:2x2x1
jax: 0.10.0
libtpu: 0.0.40
codegen_flags: <defaults>
</compile_context>

<pallas_src>
import functools

import jax
import jax.numpy as jnp
from jax.experimental import pallas as pl
from jax.experimental.pallas import tpu as pltpu


# ----------------------------- fused kernel ----------------------------------
def _fused_kernel(lbl_ref, cf_ref, mean_ref, lstd_ref, om_ref, os_ref, *, tile_b):
    # ---- class statistics: VPU broadcast-multiply + sublane reduce (no MXU) ----
    cf = cf_ref[...]                           # (N, 1)
    m = mean_ref[...]                          # (N, C)
    ev = jnp.exp(2.0 * lstd_ref[...])          # exp(lstd)^2 with a single exp
    full_mean = jnp.sum(cf * m, axis=0, keepdims=True)        # (1, C)
    full_sq = jnp.sum(cf * (m * m), axis=0, keepdims=True)    # (1, C)
    full_ev = jnp.sum(cf * ev, axis=0, keepdims=True)         # (1, C)
    full_var = full_sq - full_mean * full_mean
    full_std = jnp.sqrt(jnp.maximum(full_var + full_ev, 1e-8))
    inv_std = 1.0 / full_std                   # exact reciprocal, hoisted
    fm_scaled = full_mean * inv_std

    # ---- gather labelled rows from the VMEM-resident tables + normalize ------
    base = pl.program_id(0) * tile_b
    for r in range(tile_b):                    # short static unroll per tile
        lab = lbl_ref[base + r]                # scalar label from SMEM
        m_row = mean_ref[pl.ds(lab, 1), :]     # (1, C) dynamic sublane gather
        l_row = lstd_ref[pl.ds(lab, 1), :]
        om_ref[pl.ds(r, 1), :] = m_row * inv_std - fm_scaled
        os_ref[pl.ds(r, 1), :] = jnp.exp(l_row) * inv_std


# ------------------------------- wrapper --------------------------------------
def label_embedder_forward(labels, mean, lstd, class_freq, *, tile_b=None):
    """Pallas implementation of LabelEmbedder.forward.

    labels:     [B] int32 class ids
    mean, lstd: [nclass, code_size] f32 parameters
    class_freq: [nclass] f32 buffer
    returns (out_mean, out_std), each [B, code_size] f32
    """
    nclass, code = mean.shape
    b = labels.shape[0]

    if tile_b is None:
        tile_b = b if b <= 16 else 16          # rows per grid step (static unroll)
    b_pad = pl.cdiv(b, tile_b) * tile_b
    labels_p = jnp.pad(labels.astype(jnp.int32), (0, b_pad - b))

    kernel = functools.partial(_fused_kernel, tile_b=tile_b)

    out_m, out_s = pl.pallas_call(
        kernel,
        out_shape=(jax.ShapeDtypeStruct((b_pad, code), jnp.float32),
                   jax.ShapeDtypeStruct((b_pad, code), jnp.float32)),
        grid_spec=pltpu.PrefetchScalarGridSpec(
            num_scalar_prefetch=1,             # labels -> SMEM
            grid=(b_pad // tile_b,),
            in_specs=[
                pl.BlockSpec((nclass, 1), lambda i, lbl: (0, 0)),      # class_freq
                pl.BlockSpec((nclass, code), lambda i, lbl: (0, 0)),   # mean (resident)
                pl.BlockSpec((nclass, code), lambda i, lbl: (0, 0)),   # lstd (resident)
            ],
            out_specs=(
                pl.BlockSpec((tile_b, code), lambda i, lbl: (i, 0)),
                pl.BlockSpec((tile_b, code), lambda i, lbl: (i, 0)),
            ),
        ),
        compiler_params=pltpu.CompilerParams(
            # rows are fully independent; stats recomputed per step, so the
            # batch axis can be sharded across v7x's two TensorCores.
            dimension_semantics=("parallel",)),
    )(labels_p,
      class_freq.reshape(nclass, 1).astype(jnp.float32),
      mean.astype(jnp.float32),
      lstd.astype(jnp.float32))

    return out_m[:b], out_s[:b]


# --------------------------- plain-JAX reference ------------------------------
def _reference(labels, mean, lstd, class_freq):
    full_mean = class_freq @ mean
    full_var = class_freq @ (mean ** 2) - full_mean ** 2
    full_ev = class_freq @ (jnp.exp(lstd) ** 2)
    full_std = jnp.sqrt(jnp.maximum(full_var + full_ev, 1e-8))
    return ((mean[labels] - full_mean) / full_std,
            jnp.exp(lstd[labels]) / full_std)


if __name__ == "__main__":
    nclass, code_size, batch = 8, 32, 8

    key = jax.random.PRNGKey(0)
    k_mean, k_lstd, k_lbl = jax.random.split(key, 3)

    # Deterministic, nontrivial parameter values (module declares zeros of
    # these shapes; random values exercise the normalization path).
    mean = (0.5 * jax.random.normal(k_mean, (nclass, code_size))).astype(jnp.float32)
    lstd = (0.1 * jax.random.normal(k_lstd, (nclass, code_size))).astype(jnp.float32)
    # default buffer: class_freq = ones(nclass) / nclass
    class_freq = (jnp.ones((nclass,)) / nclass).astype(jnp.float32)

    labels = jax.random.randint(k_lbl, (batch,), 0, nclass, dtype=jnp.int32)

    out_mean, out_std = label_embedder_forward(labels, mean, lstd, class_freq)
    jax.block_until_ready((out_mean, out_std))

    ref_mean, ref_std = _reference(labels, mean, lstd, class_freq)
    assert out_mean.shape == (batch, code_size) and out_std.shape == (batch, code_size)
    assert jnp.allclose(out_mean, ref_mean, atol=1e-5, rtol=1e-5)
    assert jnp.allclose(out_std, ref_std, atol=1e-5, rtol=1e-5)

    print("KERNEL_OK")
</pallas_src>

<mosaic_0001>
module attributes {stable_mosaic.version = 11 : i64} {
  func.func @_fused_kernel(%arg0: i32, %arg1: memref<8xi32, #tpu.memory_space<smem>>, %arg2: memref<8x1xf32, #tpu.memory_space<vmem>>, %arg3: memref<8x32xf32, #tpu.memory_space<vmem>>, %arg4: memref<8x32xf32, #tpu.memory_space<vmem>>, %arg5: memref<8x32xf32, #tpu.memory_space<vmem>>, %arg6: memref<8x32xf32, #tpu.memory_space<vmem>>) attributes {dimension_semantics = [#tpu.dimension_semantics<parallel>], iteration_bounds = array<i64: 1>, scalar_prefetch = 1 : i64, scratch_operands = 0 : i64, tpu.core_type = #tpu.core_type<tc>, window_params = [{pipeline_mode = #tpu.pipeline_mode<synchronous>, transform_indices = @transform_0, window_bounds = array<i64: 8, 1>}, {pipeline_mode = #tpu.pipeline_mode<synchronous>, transform_indices = @transform_1, window_bounds = array<i64: 8, 32>}, {pipeline_mode = #tpu.pipeline_mode<synchronous>, transform_indices = @transform_2, window_bounds = array<i64: 8, 32>}, {transform_indices = @transform_3, window_bounds = array<i64: 8, 32>}, {transform_indices = @transform_4, window_bounds = array<i64: 8, 32>}]} {
    %c0 = arith.constant 0 : index
    %c0_0 = arith.constant 0 : index
    %0 = vector.load %arg2[%c0, %c0_0] : memref<8x1xf32, #tpu.memory_space<vmem>>, vector<8x1xf32>
    %c0_1 = arith.constant 0 : index
    %c0_2 = arith.constant 0 : index
    %1 = vector.load %arg3[%c0_1, %c0_2] : memref<8x32xf32, #tpu.memory_space<vmem>>, vector<8x32xf32>
    %c0_3 = arith.constant 0 : index
    %c0_4 = arith.constant 0 : index
    %2 = vector.load %arg4[%c0_3, %c0_4] : memref<8x32xf32, #tpu.memory_space<vmem>>, vector<8x32xf32>
    %cst = arith.constant 2.000000e+00 : f32
    %3 = vector.broadcast %cst : f32 to vector<8x32xf32>
    %4 = arith.mulf %3, %2 : vector<8x32xf32>
    %5 = math.exp %4 : vector<8x32xf32>
    %6 = vector.broadcast %0 : vector<8x1xf32> to vector<8x32xf32>
    %7 = arith.mulf %6, %1 : vector<8x32xf32>
    %cst_5 = arith.constant dense<0.000000e+00> : vector<32xf32>
    %8 = vector.multi_reduction <add>, %7, %cst_5 [0] : vector<8x32xf32> to vector<32xf32>
    %9 = vector.shape_cast %8 : vector<32xf32> to vector<1x32xf32>
    %10 = arith.mulf %1, %1 : vector<8x32xf32>
    %11 = vector.broadcast %0 : vector<8x1xf32> to vector<8x32xf32>
    %12 = arith.mulf %11, %10 : vector<8x32xf32>
    %cst_6 = arith.constant dense<0.000000e+00> : vector<32xf32>
    %13 = vector.multi_reduction <add>, %12, %cst_6 [0] : vector<8x32xf32> to vector<32xf32>
    %14 = vector.shape_cast %13 : vector<32xf32> to vector<1x32xf32>
    %15 = vector.broadcast %0 : vector<8x1xf32> to vector<8x32xf32>
    %16 = arith.mulf %15, %5 : vector<8x32xf32>
    %cst_7 = arith.constant dense<0.000000e+00> : vector<32xf32>
    %17 = vector.multi_reduction <add>, %16, %cst_7 [0] : vector<8x32xf32> to vector<32xf32>
    %18 = vector.shape_cast %17 : vector<32xf32> to vector<1x32xf32>
    %19 = arith.mulf %9, %9 : vector<1x32xf32>
    %20 = arith.subf %14, %19 : vector<1x32xf32>
    %21 = arith.addf %20, %18 : vector<1x32xf32>
    %cst_8 = arith.constant 9.99999993E-9 : f32
    %22 = vector.broadcast %cst_8 : f32 to vector<1x32xf32>
    %23 = arith.maximumf %21, %22 : vector<1x32xf32>
    %24 = math.sqrt %23 : vector<1x32xf32>
    %cst_9 = arith.constant 1.000000e+00 : f32
    %25 = vector.broadcast %cst_9 : f32 to vector<1x32xf32>
    %26 = arith.divf %25, %24 : vector<1x32xf32>
    %27 = arith.mulf %9, %26 : vector<1x32xf32>
    %c8_i32 = arith.constant 8 : i32
    %28 = arith.muli %arg0, %c8_i32 : i32
    %c0_i32 = arith.constant 0 : i32
    %29 = arith.addi %28, %c0_i32 : i32
    %30 = arith.index_cast %29 : i32 to index
    %31 = memref.load %arg1[%30] : memref<8xi32, #tpu.memory_space<smem>>
    %32 = arith.index_cast %31 : i32 to index
    %c0_10 = arith.constant 0 : index
    %33 = vector.load %arg3[%32, %c0_10] : memref<8x32xf32, #tpu.memory_space<vmem>>, vector<1x32xf32>
    %34 = arith.index_cast %31 : i32 to index
    %c0_11 = arith.constant 0 : index
    %35 = vector.load %arg4[%34, %c0_11] : memref<8x32xf32, #tpu.memory_space<vmem>>, vector<1x32xf32>
    %36 = arith.mulf %33, %26 : vector<1x32xf32>
    %37 = arith.subf %36, %27 : vector<1x32xf32>
    %c0_12 = arith.constant 0 : index
    %c0_13 = arith.constant 0 : index
    %38 = vector.load %arg5[%c0_12, %c0_13] : memref<8x32xf32, #tpu.memory_space<vmem>>, vector<1x32xf32>
    tpu.vector_store %arg5[%c0_12, %c0_13], %37 {strides = array<i32>} : memref<8x32xf32, #tpu.memory_space<vmem>>, vector<1x32xf32>,
    %39 = math.exp %35 : vector<1x32xf32>
    %40 = arith.mulf %39, %26 : vector<1x32xf32>
    %c0_14 = arith.constant 0 : index
    %c0_15 = arith.constant 0 : index
    %41 = vector.load %arg6[%c0_14, %c0_15] : memref<8x32xf32, #tpu.memory_space<vmem>>, vector<1x32xf32>
    tpu.vector_store %arg6[%c0_14, %c0_15], %40 {strides = array<i32>} : memref<8x32xf32, #tpu.memory_space<vmem>>, vector<1x32xf32>,
    %c1_i32 = arith.constant 1 : i32
    %42 = arith.addi %28, %c1_i32 : i32
    %43 = arith.index_cast %42 : i32 to index
    %44 = memref.load %arg1[%43] : memref<8xi32, #tpu.memory_space<smem>>
    %45 = arith.index_cast %44 : i32 to index
    %c0_16 = arith.constant 0 : index
    %46 = vector.load %arg3[%45, %c0_16] : memref<8x32xf32, #tpu.memory_space<vmem>>, vector<1x32xf32>
    %47 = arith.index_cast %44 : i32 to index
    %c0_17 = arith.constant 0 : index
    %48 = vector.load %arg4[%47, %c0_17] : memref<8x32xf32, #tpu.memory_space<vmem>>, vector<1x32xf32>
    %49 = arith.mulf %46, %26 : vector<1x32xf32>
    %50 = arith.subf %49, %27 : vector<1x32xf32>
    %c1 = arith.constant 1 : index
    %c0_18 = arith.constant 0 : index
    %51 = vector.load %arg5[%c1, %c0_18] : memref<8x32xf32, #tpu.memory_space<vmem>>, vector<1x32xf32>
    tpu.vector_store %arg5[%c1, %c0_18], %50 {strides = array<i32>} : memref<8x32xf32, #tpu.memory_space<vmem>>, vector<1x32xf32>,
    %52 = math.exp %48 : vector<1x32xf32>
    %53 = arith.mulf %52, %26 : vector<1x32xf32>
    %c1_19 = arith.constant 1 : index
    %c0_20 = arith.constant 0 : index
    %54 = vector.load %arg6[%c1_19, %c0_20] : memref<8x32xf32, #tpu.memory_space<vmem>>, vector<1x32xf32>
    tpu.vector_store %arg6[%c1_19, %c0_20], %53 {strides = array<i32>} : memref<8x32xf32, #tpu.memory_space<vmem>>, vector<1x32xf32>,
    %c2_i32 = arith.constant 2 : i32
    %55 = arith.addi %28, %c2_i32 : i32
    %56 = arith.index_cast %55 : i32 to index
    %57 = memref.load %arg1[%56] : memref<8xi32, #tpu.memory_space<smem>>
    %58 = arith.index_cast %57 : i32 to index
    %c0_21 = arith.constant 0 : index
    %59 = vector.load %arg3[%58, %c0_21] : memref<8x32xf32, #tpu.memory_space<vmem>>, vector<1x32xf32>
    %60 = arith.index_cast %57 : i32 to index
    %c0_22 = arith.constant 0 : index
    %61 = vector.load %arg4[%60, %c0_22] : memref<8x32xf32, #tpu.memory_space<vmem>>, vector<1x32xf32>
    %62 = arith.mulf %59, %26 : vector<1x32xf32>
    %63 = arith.subf %62, %27 : vector<1x32xf32>
    %c2 = arith.constant 2 : index
    %c0_23 = arith.constant 0 : index
    %64 = vector.load %arg5[%c2, %c0_23] : memref<8x32xf32, #tpu.memory_space<vmem>>, vector<1x32xf32>
    tpu.vector_store %arg5[%c2, %c0_23], %63 {strides = array<i32>} : memref<8x32xf32, #tpu.memory_space<vmem>>, vector<1x32xf32>,
    %65 = math.exp %61 : vector<1x32xf32>
    %66 = arith.mulf %65, %26 : vector<1x32xf32>
    %c2_24 = arith.constant 2 : index
    %c0_25 = arith.constant 0 : index
    %67 = vector.load %arg6[%c2_24, %c0_25] : memref<8x32xf32, #tpu.memory_space<vmem>>, vector<1x32xf32>
    tpu.vector_store %arg6[%c2_24, %c0_25], %66 {strides = array<i32>} : memref<8x32xf32, #tpu.memory_space<vmem>>, vector<1x32xf32>,
    %c3_i32 = arith.constant 3 : i32
    %68 = arith.addi %28, %c3_i32 : i32
    %69 = arith.index_cast %68 : i32 to index
    %70 = memref.load %arg1[%69] : memref<8xi32, #tpu.memory_space<smem>>
    %71 = arith.index_cast %70 : i32 to index
    %c0_26 = arith.constant 0 : index
    %72 = vector.load %arg3[%71, %c0_26] : memref<8x32xf32, #tpu.memory_space<vmem>>, vector<1x32xf32>
    %73 = arith.index_cast %70 : i32 to index
    %c0_27 = arith.constant 0 : index
    %74 = vector.load %arg4[%73, %c0_27] : memref<8x32xf32, #tpu.memory_space<vmem>>, vector<1x32xf32>
    %75 = arith.mulf %72, %26 : vector<1x32xf32>
    %76 = arith.subf %75, %27 : vector<1x32xf32>
    %c3 = arith.constant 3 : index
    %c0_28 = arith.constant 0 : index
    %77 = vector.load %arg5[%c3, %c0_28] : memref<8x32xf32, #tpu.memory_space<vmem>>, vector<1x32xf32>
    tpu.vector_store %arg5[%c3, %c0_28], %76 {strides = array<i32>} : memref<8x32xf32, #tpu.memory_space<vmem>>, vector<1x32xf32>,
    %78 = math.exp %74 : vector<1x32xf32>
    %79 = arith.mulf %78, %26 : vector<1x32xf32>
    %c3_29 = arith.constant 3 : index
    %c0_30 = arith.constant 0 : index
    %80 = vector.load %arg6[%c3_29, %c0_30] : memref<8x32xf32, #tpu.memory_space<vmem>>, vector<1x32xf32>
    tpu.vector_store %arg6[%c3_29, %c0_30], %79 {strides = array<i32>} : memref<8x32xf32, #tpu.memory_space<vmem>>, vector<1x32xf32>,
    %c4_i32 = arith.constant 4 : i32
    %81 = arith.addi %28, %c4_i32 : i32
    %82 = arith.index_cast %81 : i32 to index
    %83 = memref.load %arg1[%82] : memref<8xi32, #tpu.memory_space<smem>>
    %84 = arith.index_cast %83 : i32 to index
    %c0_31 = arith.constant 0 : index
    %85 = vector.load %arg3[%84, %c0_31] : memref<8x32xf32, #tpu.memory_space<vmem>>, vector<1x32xf32>
    %86 = arith.index_cast %83 : i32 to index
    %c0_32 = arith.constant 0 : index
    %87 = vector.load %arg4[%86, %c0_32] : memref<8x32xf32, #tpu.memory_space<vmem>>, vector<1x32xf32>
    %88 = arith.mulf %85, %26 : vector<1x32xf32>
    %89 = arith.subf %88, %27 : vector<1x32xf32>
    %c4 = arith.constant 4 : index
    %c0_33 = arith.constant 0 : index
    %90 = vector.load %arg5[%c4, %c0_33] : memref<8x32xf32, #tpu.memory_space<vmem>>, vector<1x32xf32>
    tpu.vector_store %arg5[%c4, %c0_33], %89 {strides = array<i32>} : memref<8x32xf32, #tpu.memory_space<vmem>>, vector<1x32xf32>,
    %91 = math.exp %87 : vector<1x32xf32>
    %92 = arith.mulf %91, %26 : vector<1x32xf32>
    %c4_34 = arith.constant 4 : index
    %c0_35 = arith.constant 0 : index
    %93 = vector.load %arg6[%c4_34, %c0_35] : memref<8x32xf32, #tpu.memory_space<vmem>>, vector<1x32xf32>
    tpu.vector_store %arg6[%c4_34, %c0_35], %92 {strides = array<i32>} : memref<8x32xf32, #tpu.memory_space<vmem>>, vector<1x32xf32>,
    %c5_i32 = arith.constant 5 : i32
    %94 = arith.addi %28, %c5_i32 : i32
    %95 = arith.index_cast %94 : i32 to index
    %96 = memref.load %arg1[%95] : memref<8xi32, #tpu.memory_space<smem>>
    %97 = arith.index_cast %96 : i32 to index
    %c0_36 = arith.constant 0 : index
    %98 = vector.load %arg3[%97, %c0_36] : memref<8x32xf32, #tpu.memory_space<vmem>>, vector<1x32xf32>
    %99 = arith.index_cast %96 : i32 to index
    %c0_37 = arith.constant 0 : index
    %100 = vector.load %arg4[%99, %c0_37] : memref<8x32xf32, #tpu.memory_space<vmem>>, vector<1x32xf32>
    %101 = arith.mulf %98, %26 : vector<1x32xf32>
    %102 = arith.subf %101, %27 : vector<1x32xf32>
    %c5 = arith.constant 5 : index
    %c0_38 = arith.constant 0 : index
    %103 = vector.load %arg5[%c5, %c0_38] : memref<8x32xf32, #tpu.memory_space<vmem>>, vector<1x32xf32>
    tpu.vector_store %arg5[%c5, %c0_38], %102 {strides = array<i32>} : memref<8x32xf32, #tpu.memory_space<vmem>>, vector<1x32xf32>,
    %104 = math.exp %100 : vector<1x32xf32>
    %105 = arith.mulf %104, %26 : vector<1x32xf32>
    %c5_39 = arith.constant 5 : index
    %c0_40 = arith.constant 0 : index
    %106 = vector.load %arg6[%c5_39, %c0_40] : memref<8x32xf32, #tpu.memory_space<vmem>>, vector<1x32xf32>
    tpu.vector_store %arg6[%c5_39, %c0_40], %105 {strides = array<i32>} : memref<8x32xf32, #tpu.memory_space<vmem>>, vector<1x32xf32>,
    %c6_i32 = arith.constant 6 : i32
    %107 = arith.addi %28, %c6_i32 : i32
    %108 = arith.index_cast %107 : i32 to index
    %109 = memref.load %arg1[%108] : memref<8xi32, #tpu.memory_space<smem>>
    %110 = arith.index_cast %109 : i32 to index
    %c0_41 = arith.constant 0 : index
    %111 = vector.load %arg3[%110, %c0_41] : memref<8x32xf32, #tpu.memory_space<vmem>>, vector<1x32xf32>
    %112 = arith.index_cast %109 : i32 to index
    %c0_42 = arith.constant 0 : index
    %113 = vector.load %arg4[%112, %c0_42] : memref<8x32xf32, #tpu.memory_space<vmem>>, vector<1x32xf32>
    %114 = arith.mulf %111, %26 : vector<1x32xf32>
    %115 = arith.subf %114, %27 : vector<1x32xf32>
    %c6 = arith.constant 6 : index
    %c0_43 = arith.constant 0 : index
    %116 = vector.load %arg5[%c6, %c0_43] : memref<8x32xf32, #tpu.memory_space<vmem>>, vector<1x32xf32>
    tpu.vector_store %arg5[%c6, %c0_43], %115 {strides = array<i32>} : memref<8x32xf32, #tpu.memory_space<vmem>>, vector<1x32xf32>,
    %117 = math.exp %113 : vector<1x32xf32>
    %118 = arith.mulf %117, %26 : vector<1x32xf32>
    %c6_44 = arith.constant 6 : index
    %c0_45 = arith.constant 0 : index
    %119 = vector.load %arg6[%c6_44, %c0_45] : memref<8x32xf32, #tpu.memory_space<vmem>>, vector<1x32xf32>
    tpu.vector_store %arg6[%c6_44, %c0_45], %118 {strides = array<i32>} : memref<8x32xf32, #tpu.memory_space<vmem>>, vector<1x32xf32>,
    %c7_i32 = arith.constant 7 : i32
    %120 = arith.addi %28, %c7_i32 : i32
    %121 = arith.index_cast %120 : i32 to index
    %122 = memref.load %arg1[%121] : memref<8xi32, #tpu.memory_space<smem>>
    %123 = arith.index_cast %122 : i32 to index
    %c0_46 = arith.constant 0 : index
    %124 = vector.load %arg3[%123, %c0_46] : memref<8x32xf32, #tpu.memory_space<vmem>>, vector<1x32xf32>
    %125 = arith.index_cast %122 : i32 to index
    %c0_47 = arith.constant 0 : index
    %126 = vector.load %arg4[%125, %c0_47] : memref<8x32xf32, #tpu.memory_space<vmem>>, vector<1x32xf32>
    %127 = arith.mulf %124, %26 : vector<1x32xf32>
    %128 = arith.subf %127, %27 : vector<1x32xf32>
    %c7 = arith.constant 7 : index
    %c0_48 = arith.constant 0 : index
    %129 = vector.load %arg5[%c7, %c0_48] : memref<8x32xf32, #tpu.memory_space<vmem>>, vector<1x32xf32>
    tpu.vector_store %arg5[%c7, %c0_48], %128 {strides = array<i32>} : memref<8x32xf32, #tpu.memory_space<vmem>>, vector<1x32xf32>,
    %130 = math.exp %126 : vector<1x32xf32>
    %131 = arith.mulf %130, %26 : vector<1x32xf32>
    %c7_49 = arith.constant 7 : index
    %c0_50 = arith.constant 0 : index
    %132 = vector.load %arg6[%c7_49, %c0_50] : memref<8x32xf32, #tpu.memory_space<vmem>>, vector<1x32xf32>
    tpu.vector_store %arg6[%c7_49, %c0_50], %131 {strides = array<i32>} : memref<8x32xf32, #tpu.memory_space<vmem>>, vector<1x32xf32>,
    return
  }
  func.func @transform_0(%arg0: i32, %arg1: memref<8xi32, #tpu.memory_space<smem>>) -> (i32, i32) {
    %c0_i32 = arith.constant 0 : i32
    %c0_i32_0 = arith.constant 0 : i32
    %c0_i32_1 = arith.constant 0 : i32
    return %c0_i32, %c0_i32_0 : i32, i32
  }
  func.func @transform_1(%arg0: i32, %arg1: memref<8xi32, #tpu.memory_space<smem>>) -> (i32, i32) {
    %c0_i32 = arith.constant 0 : i32
    %c0_i32_0 = arith.constant 0 : i32
    %c0_i32_1 = arith.constant 0 : i32
    return %c0_i32, %c0_i32_0 : i32, i32
  }
  func.func @transform_2(%arg0: i32, %arg1: memref<8xi32, #tpu.memory_space<smem>>) -> (i32, i32) {
    %c0_i32 = arith.constant 0 : i32
    %c0_i32_0 = arith.constant 0 : i32
    %c0_i32_1 = arith.constant 0 : i32
    return %c0_i32, %c0_i32_0 : i32, i32
  }
  func.func @transform_3(%arg0: i32, %arg1: memref<8xi32, #tpu.memory_space<smem>>) -> (i32, i32) {
    %c0_i32 = arith.constant 0 : i32
    %c0_i32_0 = arith.constant 0 : i32
    return %arg0, %c0_i32 : i32, i32
  }
  func.func @transform_4(%arg0: i32, %arg1: memref<8xi32, #tpu.memory_space<smem>>) -> (i32, i32) {
    %c0_i32 = arith.constant 0 : i32
    %c0_i32_0 = arith.constant 0 : i32
    return %arg0, %c0_i32 : i32, i32
  }
}

</mosaic_0001>

<bundles_post_ra>
// kernel: tpu_custom_call.1
= control target key start
LH: loop header
LB: loop body
LE: loop exit
PB: predicated region body
PF: predicated region fallthrough
CT: control target
= control target key end

     0   :  { %s483_s0 = inlined_call_operand.vmem [shape: s32[8], index: 0, kind: input, shape index: {}]   ;;  %s484_s1 = inlined_call_operand.vmem [shape: f32[8,1], index: 1, kind: input, shape index: {}]   ;;  %s485_s2 = inlined_call_operand.vmem [shape: f32[8,32], index: 2, kind: input, shape index: {}]   ;;  %s486_s3 = inlined_call_operand.hbm [shape: f32[8,32], index: 3, kind: input, shape index: {}]   ;;  %s487_s4 = inlined_call_operand.hbm [shape: f32[8,32], index: 4, kind: output, shape index: {0}]   ;;  %s488_s5 = inlined_call_operand.hbm [shape: f32[8,32], index: 5, kind: output, shape index: {1}]  }
   0x1   :  { %s11_s20 = sshll.u32 %s483_s0, 4  ;;  %s12_s20 = int_to_ptr.vmem [resolvable:$true] %s11_s20 }
   0x2   :  { %s273_s21 = scalar_lea.vmem %s12_s20, 16  ;;  %p278_p1 = scmp.lt.s32.totalorder %s12_s20, %s12_s20 }
   0x3   :  { %p274_p0 = scmp.ne.s32.totalorder %s12_s20, %s273_s21  ;;  %p279_p2 = scmp.lt.s32.totalorder %s273_s21, %s273_s21 }
   0x5   :  { %p280_p3 = por %p279_p2, %p278_p1 }
   0x7   :  { %p281_p4 = pnand %p280_p3, %p274_p0 }
   0x9   :  { %284 = shalt.err (!%p281_p4)  }
   0xa   :  { %s353_s22 = smov [#allocation3]  }
   0xb   :  { %14 = dma.vmem_to_smem %s12_s20, 16, %s353_s22, [#allocation2] }
   0xc   :  { %345 = dma.done.wait [#allocation2], 16 }
   0xd   :  { %346 = vsyncadd [#allocation2], 4294967280 }
   0xe   :  { %16 = sfence }
   0xf   :  { %17 = vsyncpa [#allocation5], 0 }
  0x10   :  { %18 = vsyncpa [#allocation6], 0 }
  0x11   :  { %19 = vsyncpa [#allocation9], 0  ;;  %s354_s23 = smov [#allocation4]  }
  0x12   :  { %s30_s24 = sshll.u32 %s354_s23, 4  ;;  %s31_s24 = int_to_ptr.vmem [resolvable:$true] %s30_s24 }
  0x13   :  { %s293_s0 = scalar_lea.vmem %s31_s24, 128  ;;  %p298_p6 = scmp.lt.s32.totalorder %s31_s24, %s31_s24 }
  0x14   :  { %p294_p5 = scmp.ne.s32.totalorder %s31_s24, %s293_s0  ;;  %p299_p7 = scmp.lt.s32.totalorder %s293_s0, %s293_s0 }
  0x16   :  { %p300_p8 = por %p299_p7, %p298_p6 }
  0x18   :  { %p301_p9 = pnand %p300_p8, %p294_p5 }
  0x1a   :  { %304 = shalt.err (!%p301_p9)
}
  0x1b   :  { %33 = dma.hbm_to_vmem [thread:$0]  %s486_s3, 128, %s31_s24, [#allocation5]  }
  0x1c   :  { %347 = dma.done.wait [#allocation5], 128  }
  0x1d   :  { %348 = vsyncadd [#allocation5], 4294967168  ;;  %v355_v0 = vmov 0   ;;  %v37_v1 = vld [vmem:[%s484_s1] sm:$0xff]  ;;  %vm49_vm0 = vcmask 261120   ;;  %s404_s1 = sld [smem:[#allocation3]] }
  0x1e   :  { %250 = vset.pattern.permute.xlu0 %v355_v0  ;;  %v39_v2 = vld [vmem:[#allocation4] sm:$0xff]  ;;  %s406_s3 = sld [smem:[#allocation3 + $0x1]]  ;;  %vm96_vm3 = vcmask 253952  }
  0x1f   :  { %45 = vperm.xlu0 %250, %v37_v1   ;;  %v40_v3 = vmul.f32 2.0, %v39_v2  ;;  %v38_v5 = vld [vmem:[%s485_s2] sm:$0xff]  ;;  %s408_s6 = sld [smem:[#allocation3 + $0x2]] }
  0x20   :  { %v57_v6 = vmul.f32 %v38_v5, %v38_v5  ;;  %s410_s7 = sld [smem:[#allocation3 + $0x3]] }
  0x21   :  { %v41_v4 = vmul.f32 1.442695, %v40_v3  ;;  %s412_s8 = sld [smem:[#allocation3 + $0x4]] }
  0x22   :  { %s414_s9 = sld [smem:[#allocation3 + $0x5]] }
  0x23   :  { %251 = vpow2.f32 %v41_v4  ;;  %s416_s10 = sld [smem:[#allocation3 + $0x6]]  ;;  %s92_s12 = scalar_lea.vmem [#allocation4], %s404_s1 }
  0x24   :  { %s418_s11 = sld [smem:[#allocation3 + $0x7]]  ;;  %v93_v37 = vld [vmem:[%s92_s12] sm:$0x1]  ;;  %s106_s13 = scalar_lea.vmem [#allocation4], %s406_s3 }
  0x25   :  { %v107_v38 = vld [vmem:[%s106_s13] sm:$0x1]  ;;  %s119_s14 = scalar_lea.vmem [#allocation4], %s408_s6  ;;  %v98_v40 = vmul.f32 1.442695, %v93_v37  ;;  %s90_s22 = scalar_lea.vmem %s485_s2, %s404_s1 }
  0x26   :  { %v120_v39 = vld [vmem:[%s119_s14] sm:$0x1]  ;;  %s132_s15 = scalar_lea.vmem [#allocation4], %s410_s7  ;;  %v111_v42 = vmul.f32 1.442695, %v107_v38  ;;  %s104_s0 = scalar_lea.vmem %s485_s2, %s406_s3 }
  0x27   :  { %v133_v41 = vld [vmem:[%s132_s15] sm:$0x1]  ;;  %v124_v43 = vmul.f32 1.442695, %v120_v39  ;;  %s145_s16 = scalar_lea.vmem [#allocation4], %s412_s8  ;;  %s117_s27 = scalar_lea.vmem %s485_s2, %s408_s6 }
  0x28   :  { %v146_v44 = vld [vmem:[%s145_s16] sm:$0x1]  ;;  %v137_v46 = vmul.f32 1.442695, %v133_v41  ;;  %s158_s17 = scalar_lea.vmem [#allocation4], %s414_s9  ;;  %s130_s30 = scalar_lea.vmem %s485_s2, %s410_s7 }
  0x29   :  { %v159_v47 = vld [vmem:[%s158_s17] sm:$0x1]  ;;  %s171_s18 = scalar_lea.vmem [#allocation4], %s416_s10  ;;  %v150_v51 = vmul.f32 1.442695, %v146_v44  ;;  %s143_s14 = scalar_lea.vmem %s485_s2, %s412_s8 }
  0x2a   :  { %v172_v49 = vld [vmem:[%s171_s18] sm:$0x1]  ;;  %s184_s19 = scalar_lea.vmem [#allocation4], %s418_s11  ;;  %v163_v54 = vmul.f32 1.442695, %v159_v47  ;;  %s156_s1 = scalar_lea.vmem %s485_s2, %s414_s9 }
  0x2b   :  { %v185_v52 = vld [vmem:[%s184_s19] sm:$0x1]  ;;  %v176_v56 = vmul.f32 1.442695, %v172_v49  ;;  %s169_s3 = scalar_lea.vmem %s485_s2, %s416_s10  ;;  %s182_s7 = scalar_lea.vmem %s485_s2, %s418_s11 }
  0x2c   :  { %v189_v57 = vmul.f32 1.442695, %v185_v52  ;;  %v91_v60 = vld [vmem:[%s90_s22] sm:$0x1]  ;;  %s356_s2 = smov [#allocation7]   ;;  %s357_s9 = smov [#allocation8]  }
  0x2d   :  { %v105_v61 = vld [vmem:[%s104_s0] sm:$0x1]  ;;  %s199_s8 = sshll.u32 %s356_s2, 4  ;;  %s209_s10 = sshll.u32 %s357_s9, 4  ;;  %s200_s8 = int_to_ptr.vmem [resolvable:$true] %s199_s8  ;;  %s210_s10 = int_to_ptr.vmem [resolvable:$true] %s209_s10 }
  0x2e   :  { %v118_v63 = vld [vmem:[%s117_s27] sm:$0x1]  ;;  %s305_s11 = scalar_lea.vmem %s200_s8, 128  ;;  %p310_p11 = scmp.lt.s32.totalorder %s200_s8, %s200_s8 }
  0x2f   :  { %v131_v0 = vld [vmem:[%s130_s30] sm:$0x1]  ;;  %p306_p10 = scmp.ne.s32.totalorder %s200_s8, %s305_s11  ;;  %p311_p12 = scmp.lt.s32.totalorder %s305_s11, %s305_s11 }
  0x30   :  { %v252_v7 = vpop.eup %251  ;;  %v144_v1 = vld [vmem:[%s143_s14] sm:$0x1] }
  0x31   :  { %v157_v3 = vld [vmem:[%s156_s1] sm:$0x1]  ;;  %p312_p13 = por %p311_p12, %p310_p11 }
  0x32   :  { %v170_v4 = vld [vmem:[%s169_s3] sm:$0x1] }
  0x33   :  { %p313_p0 = pnand %p312_p13, %p306_p10 }
  0x9a   :  { %v46_v8 = vpop.permute.xlu0 %45 }
  0x9b   :  { %v48_v9 = vmul.f32 %v46_v8, %v38_v5  ;;  %v58_v10 = vmul.f32 %v57_v6, %v46_v8  ;;  %v66_v11 = vmul.f32 %v252_v7, %v46_v8  ;;  %v183_v6 = vld [vmem:[%s182_s7] sm:$0x1] }
  0x9d   :  { %v50_v12 = vsel %vm49_vm0, %v48_v9, 0.0  ;;  %v59_v13 = vsel %vm49_vm0, %v58_v10, 0.0  ;;  %v67_v14 = vsel %vm49_vm0, %v66_v11, 0.0 }
  0x9e   :  { %v51_v15 = vrot.slane %v50_v12, 4  ;;  %v60_v16 = vrot.slane %v59_v13, 4  ;;  %v68_v17 = vrot.slane %v67_v14, 4 }
  0xa0   :  { %v52_v18 = vadd.f32 %v51_v15, %v50_v12  ;;  %v61_v19 = vadd.f32 %v60_v16, %v59_v13  ;;  %v69_v20 = vadd.f32 %v68_v17, %v67_v14 }
  0xa2   :  { %v53_v21 = vrot.slane %v52_v18, 2  ;;  %v62_v22 = vrot.slane %v61_v19, 2  ;;  %v70_v23 = vrot.slane %v69_v20, 2 }
  0xa4   :  { %v54_v24 = vadd.f32 %v53_v21, %v52_v18  ;;  %v63_v25 = vadd.f32 %v62_v22, %v61_v19  ;;  %v71_v26 = vadd.f32 %v70_v23, %v69_v20 }
  0xa6   :  { %v55_v27 = vrot.slane %v54_v24, 1  ;;  %v64_v28 = vrot.slane %v63_v25, 1  ;;  %v72_v30 = vrot.slane %v71_v26, 1 }
  0xa8   :  { %v400_v29 = vadd.f32 %v55_v27, %v54_v24  ;;  %v65_v31 = vadd.f32 %v64_v28, %v63_v25  ;;  %v73_v33 = vadd.f32 %v72_v30, %v71_v26 }
  0xaa   :  { %v74_v32 = vmul.f32 %v400_v29, %v400_v29 }
  0xac   :  { %v75_v34 = vsub.f32 %v65_v31, %v74_v32 }
  0xae   :  { %v76_v35 = vadd.f32 %v75_v34, %v73_v33 }
  0xb0   :  { %v77_v36 = vmax.f32 %v76_v35, 1e-08 }
  0xb2   :  { %253 = vrsqrt.f32 %v77_v36  ;;  %vm80_vm1 = vcmp.eq.f32.partialorder %v77_v36, inf  ;;  %v83_v50 = vand.u32 2147483648, %v77_v36  ;;  %vm82_vm2 = vcmp.eq.f32.partialorder %v77_v36, 0.0 }
  0xb3   :  { %255 = vpow2.f32 %v98_v40 }
  0xb4   :  { %257 = vpow2.f32 %v111_v42 }
  0xb5   :  { %259 = vpow2.f32 %v124_v43 }
  0xb6   :  { %261 = vpow2.f32 %v137_v46 }
  0xbf   :  { %v254_v45 = vpop.eup %253 }
  0xc0   :  { %v79_v48 = vmul.f32 %v254_v45, %v77_v36  ;;  %v256_v58 = vpop.eup %255 }
  0xc1   :  { %v258_v59 = vpop.eup %257 }
  0xc2   :  { %v81_v53 = vsel %vm80_vm1, %v77_v36, %v79_v48  ;;  %v260_v62 = vpop.eup %259 }
  0xc3   :  { %v84_v55 = vsel %vm82_vm2, %v83_v50, %v81_v53  ;;  %v262_v2 = vpop.eup %261 }
  0xc4   :  { %263 = vrcp.f32 %v84_v55 }
  0xc5   :  { %265 = vpow2.f32 %v150_v51 }
  0xc6   :  { %267 = vpow2.f32 %v163_v54 }
  0xc7   :  { %269 = vpow2.f32 %v176_v56 }
  0xc8   :  { %271 = vpow2.f32 %v189_v57 }
  0xd1   :  { %v264_v5 = vpop.eup %263 }
  0xd2   :  { %v266_v7 = vpop.eup %265  ;;  %v87_v8 = vmul.f32 %v264_v5, %v400_v29  ;;  %v94_v9 = vmul.f32 %v264_v5, %v91_v60  ;;  %v108_v10 = vmul.f32 %v264_v5, %v105_v61  ;;  %v121_v11 = vmul.f32 %v264_v5, %v118_v63 }
  0xd3   :  { %v268_v12 = vpop.eup %267  ;;  %v134_v13 = vmul.f32 %v264_v5, %v131_v0  ;;  %v147_v14 = vmul.f32 %v264_v5, %v144_v1  ;;  %v160_v15 = vmul.f32 %v264_v5, %v157_v3  ;;  %v173_v16 = vmul.f32 %v264_v5, %v170_v4 }
  0xd4   :  { %v270_v17 = vpop.eup %269  ;;  %v95_v18 = vsub.f32 %v94_v9, %v87_v8  ;;  %v109_v19 = vsub.f32 %v108_v10, %v87_v8  ;;  %v122_v20 = vsub.f32 %v121_v11, %v87_v8  ;;  %v186_v21 = vmul.f32 %v264_v5, %v183_v6 }
  0xd5   :  { %v272_v22 = vpop.eup %271  ;;  %v135_v23 = vsub.f32 %v134_v13, %v87_v8  ;;  %v148_v24 = vsub.f32 %v147_v14, %v87_v8  ;;  %v161_v25 = vsub.f32 %v160_v15, %v87_v8  ;;  %v174_v26 = vsub.f32 %v173_v16, %v87_v8 }
  0xd6   :  { %97 = vst.msk [vmem:[#allocation7] sm:$0x1] %vm96_vm3, %v95_v18  ;;  %110 = vst.msk [vmem:[#allocation7 + $0x1] sm:$0x1] %vm96_vm3, %v109_v19  ;;  %v187_v27 = vsub.f32 %v186_v21, %v87_v8  ;;  %v100_v28 = vmul.f32 %v264_v5, %v256_v58  ;;  %v113_v29 = vmul.f32 %v264_v5, %v258_v59 }
  0xd7   :  { %123 = vst.msk [vmem:[#allocation7 + $0x2] sm:$0x1] %vm96_vm3, %v122_v20  ;;  %v126_v30 = vmul.f32 %v264_v5, %v260_v62  ;;  %136 = vst.msk [vmem:[#allocation7 + $0x3] sm:$0x1] %vm96_vm3, %v135_v23  ;;  %v139_v31 = vmul.f32 %v264_v5, %v262_v2  ;;  %v152_v32 = vmul.f32 %v266_v7, %v264_v5 }
  0xd8   :  { %149 = vst.msk [vmem:[#allocation7 + $0x4] sm:$0x1] %vm96_vm3, %v148_v24  ;;  %162 = vst.msk [vmem:[#allocation7 + $0x5] sm:$0x1] %vm96_vm3, %v161_v25  ;;  %v165_v33 = vmul.f32 %v268_v12, %v264_v5  ;;  %v178_v34 = vmul.f32 %v270_v17, %v264_v5  ;;  %v191_v35 = vmul.f32 %v272_v22, %v264_v5 }
  0xd9   :  { %175 = vst.msk [vmem:[#allocation7 + $0x6] sm:$0x1] %vm96_vm3, %v174_v26  ;;  %188 = vst.msk [vmem:[#allocation7 + $0x7] sm:$0x1] %vm96_vm3, %v187_v27 }
  0xda   :  { %101 = vst.msk [vmem:[#allocation8] sm:$0x1] %vm96_vm3, %v100_v28  ;;  %114 = vst.msk [vmem:[#allocation8 + $0x1] sm:$0x1] %vm96_vm3, %v113_v29 }
  0xdb   :  { %127 = vst.msk [vmem:[#allocation8 + $0x2] sm:$0x1] %vm96_vm3, %v126_v30 }
  0xdc   :  { %316 = shalt.err (!%p313_p0)
}
  0xdd   :  { %202 = dma.vmem_to_hbm [thread:$0]  %s200_s8, 128, %s487_s4, [#allocation6]   ;;  %140 = vst.msk [vmem:[#allocation8 + $0x3] sm:$0x1] %vm96_vm3, %v139_v31  ;;  %153 = vst.msk [vmem:[#allocation8 + $0x4] sm:$0x1] %vm96_vm3, %v152_v32 }
  0xde   :  { %166 = vst.msk [vmem:[#allocation8 + $0x5] sm:$0x1] %vm96_vm3, %v165_v33  ;;  %179 = vst.msk [vmem:[#allocation8 + $0x6] sm:$0x1] %vm96_vm3, %v178_v34  ;;  %s325_s22 = scalar_lea.vmem %s210_s10, 128  ;;  %p330_p2 = scmp.lt.s32.totalorder %s210_s10, %s210_s10 }
  0xdf   :  { %192 = vst.msk [vmem:[#allocation8 + $0x7] sm:$0x1] %vm96_vm3, %v191_v35  ;;  %p326_p1 = scmp.ne.s32.totalorder %s210_s10, %s325_s22  ;;  %p331_p3 = scmp.lt.s32.totalorder %s325_s22, %s325_s22 }
  0xe1   :  { %p332_p4 = por %p331_p3, %p330_p2 }
  0xe3   :  { %p333_p5 = pnand %p332_p4, %p326_p1 }
  0xe5   :  { %336 = shalt.err (!%p333_p5)
}
  0xe6   :  { %212 = dma.vmem_to_hbm [thread:$0]  %s210_s10, 128, %s488_s5, [#allocation9]  }
  0xe7   :  { %349 = dma.done.wait [#allocation6], 128  }
  0xe8   :  { %350 = vsyncadd [#allocation6], 4294967168 }
  0xe9   :  { %351 = dma.done.wait [#allocation9], 128  }
  0xea   :  { %352 = vsyncadd [#allocation9], 4294967168 }
  0xeb   :  { %219 = vsyncpa [#allocation5], 1 }
  0xec   :  { %220 = vsyncpa [#allocation6], 1 }
  0xed   :  { %221 = vsyncpa [#allocation9], 1 }

</bundles_post_ra>
